<compile_context>
chip_gen: v7x
topology: tpu7x:2x2x1
jax: 0.10.0
libtpu: 0.0.40
codegen_flags: <defaults>
</compile_context>

<pallas_src>
import jax
import jax.numpy as jnp
from jax.experimental import pallas as pl
from jax.experimental.pallas import tpu as pltpu

LATENT_DIM = 128
N_FEATURES = (256, 512)
NEG_SLOPE = 0.01  # nn.LeakyReLU default negative_slope


def _leaky_relu(x):
    # For 0 < slope < 1, max(x, slope*x) == where(x > 0, x, slope*x);
    # mul+max (2 VPU ops) instead of cmp+mul+select (3).
    return jnp.maximum(x, NEG_SLOPE * x)


def _round_up(n, m):
    return ((n + m - 1) // m) * m


def disc_kernel(x_ref, w1_ref, b1_ref, w2_ref, b2_ref, w3_ref, b3_ref, o_ref):
    # x tile:   (TILE_B, LATENT_DIM) -> bf16 for the MXU (no-op if already bf16).
    # w1, w2:   bf16, VMEM-resident across the whole grid (constant index_map).
    # biases:   f32, hoisted single reads.
    x = x_ref[...].astype(jnp.bfloat16)
    b1 = b1_ref[...]            # (1, 256) f32
    b2 = b2_ref[...]            # (1, 512) f32
    w3_row = w3_ref[...]        # (1, 512) f32
    b3 = b3_ref[...]            # (1, 1)   f32

    # Layer 1: bf16 MXU matmul, f32 accumulate, f32 elementwise.
    h1 = jnp.dot(x, w1_ref[...], preferred_element_type=jnp.float32) + b1
    h1 = _leaky_relu(h1)

    # Layer 2: bf16 MXU matmul, f32 accumulate, f32 elementwise.
    h2 = jnp.dot(h1.astype(jnp.bfloat16), w2_ref[...],
                 preferred_element_type=jnp.float32) + b2
    h2 = _leaky_relu(h2)

    # Layer 3 (512 -> 1): VPU multiply + XLU lane reduce instead of a
    # degenerate N=1 MXU matmul.  All f32.
    out = jnp.sum(h2 * w3_row, axis=-1, keepdims=True) + b3   # (TILE_B, 1)
    o_ref[...] = out.astype(o_ref.dtype)


def discriminator_forward(x, params, *, tile_b=1024, core_parallel=False):
    """x: (B, latent_dim) f32 (or bf16). Returns flat (B,) f32 (torch's x.view(-1)).

    Set core_parallel=True on v7x (2 TensorCores/chip) to shard the batch grid
    across cores via pltpu.CORE_PARALLEL; keep False on v5e/v6e.
    """
    (w1, b1), (w2, b2), (w3, b3) = params
    B, D = x.shape
    assert D == w1.shape[0]

    f1 = w1.shape[1]
    f2 = w2.shape[1]

    # Batch tile: sublane-aligned; default 1024 (multiple of 256 for the
    # v6e/v7x MXU M-dim). No padding of x — Pallas handles the ragged last
    # block and drops out-of-range output rows.
    tb = _round_up(min(tile_b, _round_up(B, 8)), 8)
    nb = pl.cdiv(B, tb)

    # One-time casts / reshapes in the wrapper (weights are grid-resident, so
    # this avoids per-tile VPU casts inside the kernel).
    w1b = w1.astype(jnp.bfloat16)
    w2b = w2.astype(jnp.bfloat16)
    b1r = b1.reshape(1, f1).astype(jnp.float32)
    b2r = b2.reshape(1, f2).astype(jnp.float32)
    w3r = w3.reshape(1, f2).astype(jnp.float32)
    b3r = b3.reshape(1, 1).astype(jnp.float32)

    x_bytes = 2 if x.dtype == jnp.bfloat16 else 4
    flops = 2 * B * (D * f1 + f1 * f2 + f2 * 1)
    bytes_accessed = (B * D * x_bytes + B * 4              # x in, out
                      + w1b.size * 2 + w2b.size * 2        # bf16 weights
                      + (b1r.size + b2r.size + w3r.size + b3r.size) * 4)

    batch_sem = pltpu.CORE_PARALLEL if core_parallel else "parallel"

    out = pl.pallas_call(
        disc_kernel,
        out_shape=jax.ShapeDtypeStruct((B, 1), jnp.float32),
        grid_spec=pltpu.PrefetchScalarGridSpec(
            num_scalar_prefetch=0,
            grid=(nb,),
            in_specs=[
                pl.BlockSpec((tb, D), lambda i: (i, 0)),      # x: streamed per tile
                pl.BlockSpec((D, f1), lambda i: (0, 0)),      # w1: resident
                pl.BlockSpec((1, f1), lambda i: (0, 0)),      # b1: resident
                pl.BlockSpec((f1, f2), lambda i: (0, 0)),     # w2: resident
                pl.BlockSpec((1, f2), lambda i: (0, 0)),      # b2: resident
                pl.BlockSpec((1, f2), lambda i: (0, 0)),      # w3 row: resident
                pl.BlockSpec((1, 1), lambda i: (0, 0)),       # b3: resident
            ],
            out_specs=pl.BlockSpec((tb, 1), lambda i: (i, 0)),
        ),
        compiler_params=pltpu.CompilerParams(
            dimension_semantics=(batch_sem,),
            vmem_limit_bytes=32 << 20),
        cost_estimate=pl.CostEstimate(
            flops=flops, transcendentals=0, bytes_accessed=bytes_accessed),
    )(x, w1b, b1r, w2b, b2r, w3r, b3r)

    return out.reshape(-1)  # torch's x.view(-1)


def init_params(key, latent_dim=LATENT_DIM, n_features=N_FEATURES):
    """Deterministic synthetic init (shapes match the torch module)."""
    dims = [latent_dim] + list(n_features) + [1]
    params = []
    for i in range(len(dims) - 1):
        fan_in, fan_out = dims[i], dims[i + 1]
        key, kw, kb = jax.random.split(key, 3)
        # Weights stored as (in, out), i.e. torch W^T.
        w = (jax.random.normal(kw, (fan_in, fan_out), jnp.float32)
             * (1.0 / jnp.sqrt(jnp.float32(fan_in))))
        b = jax.random.normal(kb, (1, fan_out), jnp.float32) * 0.01
        params.append((w, b))
    return params


def reference_forward(x, params):
    """Pure-JAX reference at matched precision (bf16 MXU operands, f32 accum)."""
    (w1, b1), (w2, b2), (w3, b3) = params
    h = jnp.dot(x.astype(jnp.bfloat16), w1.astype(jnp.bfloat16),
                preferred_element_type=jnp.float32) + b1.reshape(1, -1)
    h = _leaky_relu(h)
    h = jnp.dot(h.astype(jnp.bfloat16), w2.astype(jnp.bfloat16),
                preferred_element_type=jnp.float32) + b2.reshape(1, -1)
    h = _leaky_relu(h)
    return jnp.sum(h * w3.reshape(1, -1), axis=-1) + b3.reshape(-1)


if __name__ == "__main__":
    key = jax.random.PRNGKey(0)
    key, kx1, kx2 = jax.random.split(key, 3)
    params = init_params(key)

    # Small-batch check (single grid step, tb == B == 8).
    B1 = 8
    x1 = jax.random.normal(kx1, (B1, LATENT_DIM), jnp.float32)
    out1 = jax.block_until_ready(discriminator_forward(x1, params))
    ref1 = reference_forward(x1, params)
    assert out1.shape == (B1,), out1.shape
    assert jnp.allclose(out1, ref1, atol=1e-3, rtol=1e-3), (out1, ref1)

    # Multi-tile + ragged final block (no wrapper-side padding):
    # B=640 with tile_b=256 -> grid=(3,), last block has 128 valid rows.
    B2 = 640
    x2 = jax.random.normal(kx2, (B2, LATENT_DIM), jnp.float32)
    out2 = jax.block_until_ready(discriminator_forward(x2, params, tile_b=256))
    ref2 = reference_forward(x2, params)
    assert out2.shape == (B2,), out2.shape
    assert jnp.allclose(out2, ref2, atol=1e-3, rtol=1e-3)

    # Default (large) tile path, single ragged-free block.
    out3 = jax.block_until_ready(discriminator_forward(x2, params))
    assert out3.shape == (B2,)
    assert jnp.allclose(out3, ref2, atol=1e-3, rtol=1e-3)

    print("KERNEL_OK")
</pallas_src>

<mosaic_0001>
module attributes {stable_mosaic.version = 11 : i64} {
  func.func @disc_kernel(%arg0: i32, %arg1: memref<8x128xf32, #tpu.memory_space<vmem>>, %arg2: memref<128x256xbf16, #tpu.memory_space<vmem>>, %arg3: memref<1x256xf32, #tpu.memory_space<vmem>>, %arg4: memref<256x512xbf16, #tpu.memory_space<vmem>>, %arg5: memref<1x512xf32, #tpu.memory_space<vmem>>, %arg6: memref<1x512xf32, #tpu.memory_space<vmem>>, %arg7: memref<1x1xf32, #tpu.memory_space<vmem>>, %arg8: memref<8x1xf32, #tpu.memory_space<vmem>>) attributes {dimension_semantics = [#tpu.dimension_semantics<parallel>], iteration_bounds = array<i64: 1>, scalar_prefetch = 0 : i64, scratch_operands = 0 : i64, tpu.core_type = #tpu.core_type<tc>, window_params = [{transform_indices = @transform_0, window_bounds = array<i64: 8, 128>}, {pipeline_mode = #tpu.pipeline_mode<synchronous>, transform_indices = @transform_1, window_bounds = array<i64: 128, 256>}, {pipeline_mode = #tpu.pipeline_mode<synchronous>, transform_indices = @transform_2, window_bounds = array<i64: 1, 256>}, {pipeline_mode = #tpu.pipeline_mode<synchronous>, transform_indices = @transform_3, window_bounds = array<i64: 256, 512>}, {pipeline_mode = #tpu.pipeline_mode<synchronous>, transform_indices = @transform_4, window_bounds = array<i64: 1, 512>}, {pipeline_mode = #tpu.pipeline_mode<synchronous>, transform_indices = @transform_5, window_bounds = array<i64: 1, 512>}, {pipeline_mode = #tpu.pipeline_mode<synchronous>, transform_indices = @transform_6, window_bounds = array<i64: 1, 1>}, {transform_indices = @transform_7, window_bounds = array<i64: 8, 1>}]} {
    %c0 = arith.constant 0 : index
    %c0_0 = arith.constant 0 : index
    %0 = vector.load %arg1[%c0, %c0_0] : memref<8x128xf32, #tpu.memory_space<vmem>>, vector<8x128xf32>
    %1 = arith.truncf %0 : vector<8x128xf32> to vector<8x128xbf16>
    %c0_1 = arith.constant 0 : index
    %c0_2 = arith.constant 0 : index
    %2 = vector.load %arg3[%c0_1, %c0_2] : memref<1x256xf32, #tpu.memory_space<vmem>>, vector<1x256xf32>
    %c0_3 = arith.constant 0 : index
    %c0_4 = arith.constant 0 : index
    %3 = vector.load %arg5[%c0_3, %c0_4] : memref<1x512xf32, #tpu.memory_space<vmem>>, vector<1x512xf32>
    %c0_5 = arith.constant 0 : index
    %c0_6 = arith.constant 0 : index
    %4 = vector.load %arg6[%c0_5, %c0_6] : memref<1x512xf32, #tpu.memory_space<vmem>>, vector<1x512xf32>
    %c0_7 = arith.constant 0 : index
    %c0_8 = arith.constant 0 : index
    %5 = vector.load %arg7[%c0_7, %c0_8] : memref<1x1xf32, #tpu.memory_space<vmem>>, vector<1x1xf32>
    %c0_9 = arith.constant 0 : index
    %c0_10 = arith.constant 0 : index
    %6 = vector.load %arg2[%c0_9, %c0_10] : memref<128x256xbf16, #tpu.memory_space<vmem>>, vector<128x256xbf16>
    %cst = arith.constant dense<0.000000e+00> : vector<8x256xf32>
    %7 = tpu.matmul %1, %6, %cst {dimension_numbers = #tpu.dot_dimension_numbers<[1], [0], [0], [1], [0, 0, 1, 1], [], []>} : vector<8x128xbf16>, vector<128x256xbf16>, vector<8x256xf32> -> vector<8x256xf32>
    %8 = vector.broadcast %2 : vector<1x256xf32> to vector<8x256xf32>
    %9 = arith.addf %7, %8 : vector<8x256xf32>
    %cst_11 = arith.constant 0.00999999977 : f32
    %10 = vector.broadcast %cst_11 : f32 to vector<8x256xf32>
    %11 = arith.mulf %10, %9 : vector<8x256xf32>
    %12 = arith.maximumf %9, %11 : vector<8x256xf32>
    %13 = arith.truncf %12 : vector<8x256xf32> to vector<8x256xbf16>
    %c0_12 = arith.constant 0 : index
    %c0_13 = arith.constant 0 : index
    %14 = vector.load %arg4[%c0_12, %c0_13] : memref<256x512xbf16, #tpu.memory_space<vmem>>, vector<256x512xbf16>
    %cst_14 = arith.constant dense<0.000000e+00> : vector<8x512xf32>
    %15 = tpu.matmul %13, %14, %cst_14 {dimension_numbers = #tpu.dot_dimension_numbers<[1], [0], [0], [1], [0, 0, 1, 1], [], []>} : vector<8x256xbf16>, vector<256x512xbf16>, vector<8x512xf32> -> vector<8x512xf32>
    %16 = vector.broadcast %3 : vector<1x512xf32> to vector<8x512xf32>
    %17 = arith.addf %15, %16 : vector<8x512xf32>
    %cst_15 = arith.constant 0.00999999977 : f32
    %18 = vector.broadcast %cst_15 : f32 to vector<8x512xf32>
    %19 = arith.mulf %18, %17 : vector<8x512xf32>
    %20 = arith.maximumf %17, %19 : vector<8x512xf32>
    %21 = vector.broadcast %4 : vector<1x512xf32> to vector<8x512xf32>
    %22 = arith.mulf %20, %21 : vector<8x512xf32>
    %cst_16 = arith.constant dense<0.000000e+00> : vector<8xf32>
    %23 = vector.multi_reduction <add>, %22, %cst_16 [1] : vector<8x512xf32> to vector<8xf32>
    %24 = vector.shape_cast %23 : vector<8xf32> to vector<8x1xf32>
    %25 = vector.broadcast %5 : vector<1x1xf32> to vector<8x1xf32>
    %26 = arith.addf %24, %25 : vector<8x1xf32>
    %c0_17 = arith.constant 0 : index
    %c0_18 = arith.constant 0 : index
    %27 = vector.load %arg8[%c0_17, %c0_18] : memref<8x1xf32, #tpu.memory_space<vmem>>, vector<8x1xf32>
    tpu.vector_store %arg8[%c0_17, %c0_18], %26 {strides = array<i32>} : memref<8x1xf32, #tpu.memory_space<vmem>>, vector<8x1xf32>,
    return
  }
  func.func @transform_0(%arg0: i32) -> (i32, i32) {
    %c0_i32 = arith.constant 0 : i32
    %c0_i32_0 = arith.constant 0 : i32
    return %arg0, %c0_i32 : i32, i32
  }
  func.func @transform_1(%arg0: i32) -> (i32, i32) {
    %c0_i32 = arith.constant 0 : i32
    %c0_i32_0 = arith.constant 0 : i32
    %c0_i32_1 = arith.constant 0 : i32
    return %c0_i32, %c0_i32_0 : i32, i32
  }
  func.func @transform_2(%arg0: i32) -> (i32, i32) {
    %c0_i32 = arith.constant 0 : i32
    %c0_i32_0 = arith.constant 0 : i32
    %c0_i32_1 = arith.constant 0 : i32
    return %c0_i32, %c0_i32_0 : i32, i32
  }
  func.func @transform_3(%arg0: i32) -> (i32, i32) {
    %c0_i32 = arith.constant 0 : i32
    %c0_i32_0 = arith.constant 0 : i32
    %c0_i32_1 = arith.constant 0 : i32
    return %c0_i32, %c0_i32_0 : i32, i32
  }
  func.func @transform_4(%arg0: i32) -> (i32, i32) {
    %c0_i32 = arith.constant 0 : i32
    %c0_i32_0 = arith.constant 0 : i32
    %c0_i32_1 = arith.constant 0 : i32
    return %c0_i32, %c0_i32_0 : i32, i32
  }
  func.func @transform_5(%arg0: i32) -> (i32, i32) {
    %c0_i32 = arith.constant 0 : i32
    %c0_i32_0 = arith.constant 0 : i32
    %c0_i32_1 = arith.constant 0 : i32
    return %c0_i32, %c0_i32_0 : i32, i32
  }
  func.func @transform_6(%arg0: i32) -> (i32, i32) {
    %c0_i32 = arith.constant 0 : i32
    %c0_i32_0 = arith.constant 0 : i32
    %c0_i32_1 = arith.constant 0 : i32
    return %c0_i32, %c0_i32_0 : i32, i32
  }
  func.func @transform_7(%arg0: i32) -> (i32, i32) {
    %c0_i32 = arith.constant 0 : i32
    %c0_i32_0 = arith.constant 0 : i32
    return %arg0, %c0_i32 : i32, i32
  }
}

</mosaic_0001>

<bundles_post_ra>
// kernel: tpu_custom_call.1
= control target key start
LH: loop header
LB: loop body
LE: loop exit
PB: predicated region body
PF: predicated region fallthrough
CT: control target
= control target key end

     0   :  { %s1146_s0 = inlined_call_operand.hbm [shape: f32[8,128], index: 0, kind: input, shape index: {}]   ;;  %s1147_s1 = inlined_call_operand.hbm [shape: bf16[128,256], index: 1, kind: input, shape index: {}]   ;;  %s1148_s2 = inlined_call_operand.vmem [shape: f32[1,256], index: 2, kind: input, shape index: {}]   ;;  %s1149_s3 = inlined_call_operand.hbm [shape: bf16[256,512], index: 3, kind: input, shape index: {}]   ;;  %s1150_s4 = inlined_call_operand.vmem [shape: f32[1,512], index: 4, kind: input, shape index: {}]   ;;  %s1151_s5 = inlined_call_operand.vmem [shape: f32[1,512], index: 5, kind: input, shape index: {}]   ;;  %s1152_s6 = inlined_call_operand.<no memory space> [shape: f32[1,1], index: 6, kind: input, shape index: {}]   ;;  %s1153_s7 = inlined_call_operand.vmem [shape: f32[8,1], index: 7, kind: output, shape index: {}]  }
   0x1   :  { %v12_v0 = vstv %s1152_s6 }
   0x2   :  { %13 = vst [vmem:[#allocation2] sm:$0x1] %v12_v0 }
   0x3   :  { %14 = vsyncpa [#allocation4], 0 }
   0x4   :  { %15 = vsyncpa [#allocation6], 0  ;;  %s1047_s26 = smov [#allocation5]   ;;  %s977_s30 = scalar_lea.hbm %s1147_s1, 2048 }
   0x5   :  { %s31_s27 = sshll.u32 %s1047_s26, 4  ;;  %p978_p0 = scmp.ne.s32.totalorder %s1147_s1, %s977_s30  ;;  %s32_s27 = int_to_ptr.vmem [resolvable:$true] %s31_s27 }
   0x6   :  { %p981_p1 = scmp.lt.u32.totalorder %s977_s30, %s1147_s1 }
   0x8   :  { %p983_p2 = pnand %p981_p1, %p978_p0 }
   0xa   :  { %986 = shalt.err (!%p983_p2)
}
   0xb   :  { %s987_s6 = scalar_lea.vmem %s32_s27, 2048  ;;  %p992_p4 = scmp.lt.s32.totalorder %s32_s27, %s32_s27 }
   0xc   :  { %p988_p3 = scmp.ne.s32.totalorder %s32_s27, %s987_s6  ;;  %p993_p5 = scmp.lt.s32.totalorder %s987_s6, %s987_s6 }
   0xe   :  { %p994_p6 = por %p993_p5, %p992_p4 }
  0x10   :  { %p995_p7 = pnand %p994_p6, %p988_p3 }
  0x12   :  { %998 = shalt.err (!%p995_p7)
}
  0x13   :  { %s1048_s12 = smov 128   ;;  %s1049_s13 = smov 8  }
  0x14   :  { %37 = dma.hbm_to_vmem [thread:$0]  %s1147_s1, 2048, %s32_s27, [#allocation6], %s1048_s12, %s1048_s12, %s1049_s13  }
  0x15   :  { %s1050_s16 = smov [#allocation3]   ;;  %s1051_s18 = smov [#allocation7]  }
  0x16   :  { %s22_s17 = sshll.u32 %s1050_s16, 4  ;;  %s45_s19 = sshll.u32 %s1051_s18, 4  ;;  %s23_s17 = int_to_ptr.vmem [resolvable:$true] %s22_s17  ;;  %s46_s19 = int_to_ptr.vmem [resolvable:$true] %s45_s19 }
  0x17   :  { %s999_s22 = scalar_lea.hbm %s1146_s0, 128 }
  0x18   :  { %p1000_p8 = scmp.ne.s32.totalorder %s1146_s0, %s999_s22  ;;  %p1003_p9 = scmp.lt.u32.totalorder %s999_s22, %s1146_s0 }
  0x1a   :  { %p1005_p10 = pnand %p1003_p9, %p1000_p8 }
  0x1c   :  { %1008 = shalt.err (!%p1005_p10)
}
  0x1d   :  { %s1009_s1 = scalar_lea.vmem %s23_s17, 128  ;;  %p1014_p12 = scmp.lt.s32.totalorder %s23_s17, %s23_s17 }
  0x1e   :  { %p1010_p11 = scmp.ne.s32.totalorder %s23_s17, %s1009_s1  ;;  %p1015_p13 = scmp.lt.s32.totalorder %s1009_s1, %s1009_s1 }
  0x20   :  { %p1016_p0 = por %p1015_p13, %p1014_p12 }
  0x22   :  { %p1017_p1 = pnand %p1016_p0, %p1010_p11 }
  0x24   :  { %1020 = shalt.err (!%p1017_p1)
}
  0x25   :  { %25 = dma.hbm_to_vmem [thread:$0]  %s1146_s0, 128, %s23_s17, [#allocation4]  }
  0x26   :  { %s1021_s8 = scalar_lea.hbm %s1149_s3, 8192 }
  0x27   :  { %p1022_p2 = scmp.ne.s32.totalorder %s1149_s3, %s1021_s8  ;;  %p1025_p3 = scmp.lt.u32.totalorder %s1021_s8, %s1149_s3 }
  0x29   :  { %p1027_p4 = pnand %p1025_p3, %p1022_p2 }
  0x2b   :  { %1030 = shalt.err (!%p1027_p4)
}
  0x2c   :  { %s1031_s12 = scalar_lea.vmem %s46_s19, 8192  ;;  %p1036_p6 = scmp.lt.s32.totalorder %s46_s19, %s46_s19 }
  0x2d   :  { %p1032_p5 = scmp.ne.s32.totalorder %s46_s19, %s1031_s12  ;;  %p1037_p7 = scmp.lt.s32.totalorder %s1031_s12, %s1031_s12 }
  0x2f   :  { %p1038_p8 = por %p1037_p7, %p1036_p6 }
  0x31   :  { %p1039_p9 = pnand %p1038_p8, %p1032_p5 }
  0x33   :  { %1042 = shalt.err (!%p1039_p9)
}
  0x34   :  { %s1052_s0 = smov 256   ;;  %s1053_s13 = smov 16  }
  0x35   :  { %51 = dma.hbm_to_vmem [thread:$0]  %s1149_s3, 8192, %s46_s19, [#allocation6], %s1052_s0, %s1052_s0, %s1053_s13  }
  0x36   :  { %1043 = dma.done.wait [#allocation4], 128  }
  0x37   :  { %1044 = vsyncadd [#allocation4], 4294967168 }
  0x38   :  { %1045 = dma.done.wait [#allocation6], 10240  }
  0x39   :  { %1046 = vsyncadd [#allocation6], 4294957056  ;;  %v1054_v1 = vmov 0   ;;  %v857_v2 = vld [vmem:[#allocation5 + $0x4] ss:$8 sps:$4 sm:$0xff]   ;;  %v68_v27 = vld [vmem:[#allocation3] sm:$0xff] }
  0x3a   :  { %213 = vmatprep.mubr.bf16.mxu0 %v1054_v1  ;;  %v859_v3 = vld [vmem:[#allocation5] ss:$8 sps:$4 sm:$0xff]   ;;  %181 = vmatprep.subr.bf16.mxu0 %v857_v2  ;;  %v860_v4 = vld [vmem:[#allocation5 + $0x14] ss:$8 sps:$4 sm:$0xff]   ;;  %v862_v5 = vld [vmem:[#allocation5 + $0x10] ss:$8 sps:$4 sm:$0xff]   ;;  %v69_v31 = vpack.c.bf16 %v68_v27, %v68_v27 }
  0x3b   :  { %182 = vmatpush1.bf16.msra.mxu0 %v859_v3  ;;  %v863_v6 = vld [vmem:[#allocation5 + $0x24] ss:$8 sps:$4 sm:$0xff]   ;;  %v865_v7 = vld [vmem:[#allocation5 + $0x20] ss:$8 sps:$4 sm:$0xff]   ;;  %v866_v8 = vld [vmem:[#allocation5 + $0x34] ss:$8 sps:$4 sm:$0xff]  }
  0x3c   :  { %183 = vmatprep.subr.bf16.mxu0 %v860_v4  ;;  %v868_v9 = vld [vmem:[#allocation5 + $0x30] ss:$8 sps:$4 sm:$0xff]   ;;  %v881_v10 = vld [vmem:[#allocation7 + $0x4] ss:$16 sps:$4 sm:$0xff]   ;;  %v871_v14 = vld [vmem:[#allocation5 + $0x40] ss:$8 sps:$4 sm:$0xff]  }
  0x3d   :  { %v869_v11 = vld [vmem:[#allocation5 + $0x44] ss:$8 sps:$4 sm:$0xff]   ;;  %633 = vmatprep.subr.bf16.mxu1 %v881_v10  ;;  %v886_v12 = vld [vmem:[#allocation7] ss:$16 sps:$4 sm:$0xff]   ;;  %v872_v15 = vld [vmem:[#allocation5 + $0x54] ss:$8 sps:$4 sm:$0xff]  }
  0x3e   :  { %v887_v13 = vld [vmem:[#allocation7 + $0x24] ss:$16 sps:$4 sm:$0xff]   ;;  %634 = vmatpush1.bf16.msra.mxu1 %v886_v12  ;;  %v892_v16 = vld [vmem:[#allocation7 + $0x20] ss:$16 sps:$4 sm:$0xff]   ;;  %v885_v28 = vld [vmem:[#allocation7 + $0xc] ss:$16 sps:$4 sm:$0xff]  }
  0x3f   :  { %184 = vmatpush1.bf16.msra.mxu0 %v862_v5  ;;  %635 = vmatprep.subr.bf16.mxu1 %v887_v13  ;;  %v893_v17 = vld [vmem:[#allocation7 + $0x44] ss:$16 sps:$4 sm:$0xff]   ;;  %v874_v18 = vld [vmem:[#allocation5 + $0x50] ss:$8 sps:$4 sm:$0xff]   ;;  %v877_v22 = vld [vmem:[#allocation5 + $0x60] ss:$8 sps:$4 sm:$0xff]  }
  0x40   :  { %185 = vmatprep.subr.bf16.mxu0 %v863_v6  ;;  %v875_v19 = vld [vmem:[#allocation5 + $0x64] ss:$8 sps:$4 sm:$0xff]   ;;  %v898_v20 = vld [vmem:[#allocation7 + $0x40] ss:$16 sps:$4 sm:$0xff]   ;;  %v878_v23 = vld [vmem:[#allocation5 + $0x74] ss:$8 sps:$4 sm:$0xff]  }
  0x41   :  { %v899_v21 = vld [vmem:[#allocation7 + $0x64] ss:$16 sps:$4 sm:$0xff]   ;;  %v904_v24 = vld [vmem:[#allocation7 + $0x60] ss:$16 sps:$4 sm:$0xff]   ;;  %v883_v32 = vld [vmem:[#allocation7 + $0x8] ss:$16 sps:$4 sm:$0xff]  }
  0x42   :  { %636 = vmatpush1.bf16.msra.mxu1 %v892_v16  ;;  %v905_v25 = vld [vmem:[#allocation7 + $0x84] ss:$16 sps:$4 sm:$0xff]   ;;  %v880_v26 = vld [vmem:[#allocation5 + $0x70] ss:$8 sps:$4 sm:$0xff]   ;;  %v891_v33 = vld [vmem:[#allocation7 + $0x2c] ss:$16 sps:$4 sm:$0xff]  }
  0x43   :  { %186 = vmatpush1.bf16.msra.mxu0 %v865_v7  ;;  %637 = vmatprep.subr.bf16.mxu1 %v893_v17  ;;  %v910_v29 = vld [vmem:[#allocation7 + $0x80] ss:$16 sps:$4 sm:$0xff]   ;;  %v911_v30 = vld [vmem:[#allocation7 + $0xa4] ss:$16 sps:$4 sm:$0xff]   ;;  %v889_v36 = vld [vmem:[#allocation7 + $0x28] ss:$16 sps:$4 sm:$0xff]  }
  0x44   :  { %187 = vmatprep.subr.bf16.mxu0 %v866_v8  ;;  %v916_v34 = vld [vmem:[#allocation7 + $0xa0] ss:$16 sps:$4 sm:$0xff]   ;;  %v917_v35 = vld [vmem:[#allocation7 + $0xc4] ss:$16 sps:$4 sm:$0xff]   ;;  %v897_v37 = vld [vmem:[#allocation7 + $0x4c] ss:$16 sps:$4 sm:$0xff]  }
  0x45   :  { %v922_v38 = vld [vmem:[#allocation7 + $0xc0] ss:$16 sps:$4 sm:$0xff]   ;;  %v923_v39 = vld [vmem:[#allocation7 + $0xe4] ss:$16 sps:$4 sm:$0xff]   ;;  %v895_v40 = vld [vmem:[#allocation7 + $0x48] ss:$16 sps:$4 sm:$0xff]  }
  0x46   :  { %638 = vmatpush1.bf16.msra.mxu1 %v898_v20  ;;  %v903_v41 = vld [vmem:[#allocation7 + $0x6c] ss:$16 sps:$4 sm:$0xff]   ;;  %v928_v42 = vld [vmem:[#allocation7 + $0xe0] ss:$16 sps:$4 sm:$0xff]   ;;  %v929_v43 = vld [vmem:[#allocation7 + $0x104] ss:$16 sps:$4 sm:$0xff]   ;;  %v91_v20 = vlaneseq }
  0x47   :  { %188 = vmatpush1.bf16.msra.mxu0 %v868_v9  ;;  %639 = vmatprep.subr.bf16.mxu1 %v899_v21  ;;  %v901_v44 = vld [vmem:[#allocation7 + $0x68] ss:$16 sps:$4 sm:$0xff]   ;;  %v909_v45 = vld [vmem:[#allocation7 + $0x8c] ss:$16 sps:$4 sm:$0xff]   ;;  %v934_v46 = vld [vmem:[#allocation7 + $0x100] ss:$16 sps:$4 sm:$0xff]  }
  0x48   :  { %189 = vmatprep.subr.bf16.mxu0 %v869_v11  ;;  %v935_v47 = vld [vmem:[#allocation7 + $0x124] ss:$16 sps:$4 sm:$0xff]   ;;  %v907_v48 = vld [vmem:[#allocation7 + $0x88] ss:$16 sps:$4 sm:$0xff]   ;;  %v915_v49 = vld [vmem:[#allocation7 + $0xac] ss:$16 sps:$4 sm:$0xff]  }
  0x49   :  { %v940_v50 = vld [vmem:[#allocation7 + $0x120] ss:$16 sps:$4 sm:$0xff]   ;;  %v941_v51 = vld [vmem:[#allocation7 + $0x144] ss:$16 sps:$4 sm:$0xff]   ;;  %v913_v52 = vld [vmem:[#allocation7 + $0xa8] ss:$16 sps:$4 sm:$0xff]  }
  0x4a   :  { %640 = vmatpush1.bf16.msra.mxu1 %v904_v24  ;;  %v946_v53 = vld [vmem:[#allocation7 + $0x140] ss:$16 sps:$4 sm:$0xff]   ;;  %v921_v54 = vld [vmem:[#allocation7 + $0xcc] ss:$16 sps:$4 sm:$0xff]   ;;  %v947_v55 = vld [vmem:[#allocation7 + $0x164] ss:$16 sps:$4 sm:$0xff]  }
  0x4b   :  { %190 = vmatpush1.bf16.msra.mxu0 %v871_v14  ;;  %641 = vmatprep.subr.bf16.mxu1 %v905_v25  ;;  %v919_v56 = vld [vmem:[#allocation7 + $0xc8] ss:$16 sps:$4 sm:$0xff]   ;;  %v952_v57 = vld [vmem:[#allocation7 + $0x160] ss:$16 sps:$4 sm:$0xff]   ;;  %v927_v58 = vld [vmem:[#allocation7 + $0xec] ss:$16 sps:$4 sm:$0xff]  }
  0x4c   :  { %191 = vmatprep.subr.bf16.mxu0 %v872_v15  ;;  %v953_v59 = vld [vmem:[#allocation7 + $0x184] ss:$16 sps:$4 sm:$0xff]   ;;  %v925_v60 = vld [vmem:[#allocation7 + $0xe8] ss:$16 sps:$4 sm:$0xff]   ;;  %v958_v61 = vld [vmem:[#allocation7 + $0x180] ss:$16 sps:$4 sm:$0xff]  }
  0x4d   :  { %v933_v62 = vld [vmem:[#allocation7 + $0x10c] ss:$16 sps:$4 sm:$0xff]   ;;  %v959_v63 = vld [vmem:[#allocation7 + $0x1a4] ss:$16 sps:$4 sm:$0xff]   ;;  %v931_v0 = vld [vmem:[#allocation7 + $0x108] ss:$16 sps:$4 sm:$0xff]  }
  0x4e   :  { %642 = vmatpush1.bf16.msra.mxu1 %v910_v29  ;;  %v939_v1 = vld [vmem:[#allocation7 + $0x12c] ss:$16 sps:$4 sm:$0xff]   ;;  %v937_v2 = vld [vmem:[#allocation7 + $0x128] ss:$16 sps:$4 sm:$0xff]   ;;  %v964_v11 = vld [vmem:[#allocation7 + $0x1a0] ss:$16 sps:$4 sm:$0xff]  }
  0x4f   :  { %192 = vmatpush1.bf16.msra.mxu0 %v874_v18  ;;  %643 = vmatprep.subr.bf16.mxu1 %v911_v30  ;;  %v945_v3 = vld [vmem:[#allocation7 + $0x14c] ss:$16 sps:$4 sm:$0xff]   ;;  %v943_v4 = vld [vmem:[#allocation7 + $0x148] ss:$16 sps:$4 sm:$0xff]   ;;  %v965_v12 = vld [vmem:[#allocation7 + $0x1c4] ss:$16 sps:$4 sm:$0xff]  }
  0x50   :  { %193 = vmatprep.subr.bf16.mxu0 %v875_v19  ;;  %v951_v5 = vld [vmem:[#allocation7 + $0x16c] ss:$16 sps:$4 sm:$0xff]   ;;  %v949_v6 = vld [vmem:[#allocation7 + $0x168] ss:$16 sps:$4 sm:$0xff]   ;;  %v970_v15 = vld [vmem:[#allocation7 + $0x1c0] ss:$16 sps:$4 sm:$0xff]  }
  0x51   :  { %v957_v7 = vld [vmem:[#allocation7 + $0x18c] ss:$16 sps:$4 sm:$0xff]   ;;  %v955_v8 = vld [vmem:[#allocation7 + $0x188] ss:$16 sps:$4 sm:$0xff]   ;;  %v971_v16 = vld [vmem:[#allocation7 + $0x1e4] ss:$16 sps:$4 sm:$0xff]  }
  0x52   :  { %644 = vmatpush1.bf16.msra.mxu1 %v916_v34  ;;  %v963_v9 = vld [vmem:[#allocation7 + $0x1ac] ss:$16 sps:$4 sm:$0xff]   ;;  %v961_v10 = vld [vmem:[#allocation7 + $0x1a8] ss:$16 sps:$4 sm:$0xff]   ;;  %v976_v19 = vld [vmem:[#allocation7 + $0x1e0] ss:$16 sps:$4 sm:$0xff]  }
  0x53   :  { %194 = vmatpush1.bf16.msra.mxu0 %v877_v22  ;;  %645 = vmatprep.subr.bf16.mxu1 %v917_v35  ;;  %v969_v13 = vld [vmem:[#allocation7 + $0x1cc] ss:$16 sps:$4 sm:$0xff]   ;;  %v967_v14 = vld [vmem:[#allocation7 + $0x1c8] ss:$16 sps:$4 sm:$0xff]   ;;  %v92_v21 = vshrl.u32 %v91_v20, 7  ;;  %vm760_vm0 = vcmask 7168  }
  0x54   :  { %195 = vmatprep.subr.bf16.mxu0 %v878_v23  ;;  %v975_v17 = vld [vmem:[#allocation7 + $0x1ec] ss:$16 sps:$4 sm:$0xff]   ;;  %v973_v18 = vld [vmem:[#allocation7 + $0x1e8] ss:$16 sps:$4 sm:$0xff]  }
  0x55   :  { %v93_v22 = vsub.s32 0, %v92_v21  ;;  %v70_v23 = vld [vmem:[%s1148_s2] sm:$0x3]  ;;  %v97_v24 = vsub.s32 1, %v92_v21 }
  0x56   :  { %646 = vmatpush1.bf16.msra.mxu1 %v922_v38 }
  0x57   :  { %196 = vmatpush1.bf16.msra.mxu0 %v880_v26  ;;  %647 = vmatprep.subr.bf16.mxu1 %v923_v39  ;;  %v94_v25 = vrot.slane %v70_v23, %v93_v22  ;;  %v98_v26 = vrot.slane %v70_v23, %v97_v24  ;;  %v303_v39 = vsub.s32 2, %v92_v21 }
  0x58   :  { %674 = vmatprep.subr.bf16.mxu0 %v885_v28 }
  0x5a   :  { %214 = vmatmul.mubr.bf16.vlgmr.msra.gmra.mrb[0].mxu0 %v69_v31  ;;  %648 = vmatpush1.bf16.msra.mxu1 %v928_v42 }
  0x5b   :  { %675 = vmatpush1.bf16.msra.mxu0 %v883_v32  ;;  %649 = vmatprep.subr.bf16.mxu1 %v929_v43 }
  0x5c   :  { %676 = vmatprep.subr.bf16.mxu0 %v891_v33 }
  0x5e   :  { %650 = vmatpush1.bf16.msra.mxu1 %v934_v46  ;;  %v72_v46 = vld [vmem:[%s1151_s5] sm:$0xf] }
  0x5f   :  { %677 = vmatpush1.bf16.msra.mxu0 %v889_v36  ;;  %651 = vmatprep.subr.bf16.mxu1 %v935_v47 }
  0x60   :  { %678 = vmatprep.subr.bf16.mxu0 %v897_v37 }
  0x62   :  { %652 = vmatpush1.bf16.msra.mxu1 %v940_v50 }
  0x63   :  { %679 = vmatpush1.bf16.msra.mxu0 %v895_v40  ;;  %653 = vmatprep.subr.bf16.mxu1 %v941_v51  ;;  %v71_v40 = vld [vmem:[%s1150_s4] sm:$0xf] }
  0x64   :  { %680 = vmatprep.subr.bf16.mxu0 %v903_v41  ;;  %v307_v41 = vsub.s32 3, %v92_v21  ;;  %v296_v42 = vrot.slane %v71_v40, %v93_v22  ;;  %v304_v43 = vrot.slane %v71_v40, %v303_v39 }
  0x66   :  { %654 = vmatpush1.bf16.msra.mxu1 %v946_v53 }
  0x67   :  { %681 = vmatpush1.bf16.msra.mxu0 %v901_v44  ;;  %655 = vmatprep.subr.bf16.mxu1 %v947_v55  ;;  %v300_v44 = vrot.slane %v71_v40, %v97_v24 }
  0x68   :  { %682 = vmatprep.subr.bf16.mxu0 %v909_v45  ;;  %v308_v45 = vrot.slane %v71_v40, %v307_v41 }
  0x6a   :  { %656 = vmatpush1.bf16.msra.mxu1 %v952_v57 }
  0x6b   :  { %683 = vmatpush1.bf16.msra.mxu0 %v907_v48  ;;  %657 = vmatprep.subr.bf16.mxu1 %v953_v59 }
  0x6c   :  { %684 = vmatprep.subr.bf16.mxu0 %v915_v49 }
  0x6e   :  { %658 = vmatpush1.bf16.msra.mxu1 %v958_v61 }
  0x6f   :  { %685 = vmatpush1.bf16.msra.mxu0 %v913_v52  ;;  %659 = vmatprep.subr.bf16.mxu1 %v959_v63  ;;  %v731_v63 = vrot.slane %v72_v46, %v97_v24 }
  0x70   :  { %686 = vmatprep.subr.bf16.mxu0 %v921_v54 }
  0x72   :  { %660 = vmatpush1.bf16.msra.mxu1 %v964_v11 }
  0x73   :  { %687 = vmatpush1.bf16.msra.mxu0 %v919_v56  ;;  %661 = vmatprep.subr.bf16.mxu1 %v965_v12 }
  0x74   :  { %688 = vmatprep.subr.bf16.mxu0 %v927_v58  ;;  %v727_v58 = vrot.slane %v72_v46, %v93_v22 }
  0x76   :  { %662 = vmatpush1.bf16.msra.mxu1 %v970_v15 }
  0x77   :  { %689 = vmatpush1.bf16.msra.mxu0 %v925_v60  ;;  %663 = vmatprep.subr.bf16.mxu1 %v971_v16 }
  0x78   :  { %690 = vmatprep.subr.bf16.mxu0 %v933_v62 }
  0x7a   :  { %664 = vmatpush1.bf16.msra.mxu1 %v976_v19 }
  0x7b   :  { %691 = vmatpush1.bf16.msra.mxu0 %v931_v0 }
  0x7c   :  { %692 = vmatprep.subr.bf16.mxu0 %v939_v1 }
  0x7f   :  { %693 = vmatpush1.bf16.msra.mxu0 %v937_v2 }
  0x80   :  { %694 = vmatprep.subr.bf16.mxu0 %v945_v3 }
  0x83   :  { %695 = vmatpush1.bf16.msra.mxu0 %v943_v4  ;;  %v735_v4 = vrot.slane %v72_v46, %v303_v39 }
  0x84   :  { %696 = vmatprep.subr.bf16.mxu0 %v951_v5 }
  0x87   :  { %697 = vmatpush1.bf16.msra.mxu0 %v949_v6 }
  0x88   :  { %698 = vmatprep.subr.bf16.mxu0 %v957_v7 }
  0x8b   :  { %699 = vmatpush1.bf16.msra.mxu0 %v955_v8  ;;  %v739_v8 = vrot.slane %v72_v46, %v307_v41 }
  0x8c   :  { %700 = vmatprep.subr.bf16.mxu0 %v963_v9 }
  0x8f   :  { %701 = vmatpush1.bf16.msra.mxu0 %v961_v10 }
  0x90   :  { %702 = vmatprep.subr.bf16.mxu0 %v969_v13 }
  0x93   :  { %703 = vmatpush1.bf16.msra.mxu0 %v967_v14  ;;  %v848_v14 = vld [vmem:[#allocation2] ss:$0 sm:$0xff] }
  0x94   :  { %704 = vmatprep.subr.bf16.mxu0 %v975_v17 }
  0x97   :  { %705 = vmatpush1.bf16.msra.mxu0 %v973_v18 }
 0x12d   :  { %v215_v27 = vpop.f32.mrb[0].mxu0 }
 0x12e   :  { %v216_v28 = vadd.f32 %v215_v27, %v94_v25  ;;  %v217_v29 = vpop.f32.mrb[1].mxu0 }
 0x12f   :  { %v218_v30 = vadd.f32 %v217_v29, %v98_v26  ;;  %v219_v31 = vpop.f32.mrb[2].mxu0 }
 0x130   :  { %v222_v32 = vmul.f32 0.01, %v216_v28  ;;  %v220_v33 = vpop.f32.mrb[3].mxu0 }
 0x131   :  { %v223_v34 = vmul.f32 0.01, %v218_v30 }
 0x132   :  { %v224_v35 = vmax.f32 %v216_v28, %v222_v32 }
 0x133   :  { %v225_v36 = vmax.f32 %v218_v30, %v223_v34 }
 0x134   :  { %v226_v38 = vpack.c.bf16 %v224_v35, %v224_v35 }
 0x135   :  { %v227_v37 = vpack.c.bf16 %v225_v36, %v225_v36 }
 0x137   :  { %665 = vmatprep.mubr.bf16.mxu1 %v227_v37  ;;  %706 = vmatprep.mubr.bf16.mxu0 %v227_v37 }
 0x138   :  { %666 = vmatmul.mubr.bf16.vlgmr.msra.gmra.mrb[0].mxu1 %v226_v38  ;;  %707 = vmatmul.mubr.bf16.vlgmr.msra.gmra.mrb[4].mxu0 %v226_v38 }
 0x20b   :  { %v667_v47 = vpop.f32.mrb[0].mxu1  ;;  %v708_v48 = vpop.f32.mrb[4].mxu0 }
 0x20c   :  { %v668_v49 = vadd.f32 %v667_v47, %v296_v42  ;;  %v709_v50 = vadd.f32 %v708_v48, %v304_v43  ;;  %v669_v51 = vpop.f32.mrb[1].mxu1  ;;  %v710_v52 = vpop.f32.mrb[5].mxu0 }
 0x20d   :  { %v670_v53 = vadd.f32 %v669_v51, %v300_v44  ;;  %v711_v54 = vadd.f32 %v710_v52, %v308_v45  ;;  %v671_v55 = vpop.f32.mrb[2].mxu1  ;;  %v712_v56 = vpop.f32.mrb[6].mxu0 }
 0x20e   :  { %v715_v57 = vmul.f32 0.01, %v668_v49  ;;  %v717_v59 = vmul.f32 0.01, %v709_v50  ;;  %v672_v60 = vpop.f32.mrb[3].mxu1  ;;  %v713_v61 = vpop.f32.mrb[7].mxu0 }
 0x20f   :  { %v716_v62 = vmul.f32 0.01, %v670_v53  ;;  %v718_v0 = vmul.f32 0.01, %v711_v54 }
 0x210   :  { %v719_v1 = vmax.f32 %v668_v49, %v715_v57  ;;  %v721_v2 = vmax.f32 %v709_v50, %v717_v59 }
 0x211   :  { %v720_v3 = vmax.f32 %v670_v53, %v716_v62  ;;  %v722_v7 = vmax.f32 %v711_v54, %v718_v0 }
 0x212   :  { %v744_v5 = vmul.f32 %v727_v58, %v719_v1  ;;  %v746_v9 = vmul.f32 %v735_v4, %v721_v2 }
 0x213   :  { %v745_v6 = vmul.f32 %v731_v63, %v720_v3  ;;  %v747_v11 = vmul.f32 %v739_v8, %v722_v7 }
 0x215   :  { %v748_v10 = vadd.f32 %v745_v6, %v744_v5 }
 0x217   :  { %v749_v12 = vadd.f32 %v748_v10, %v746_v9 }
 0x219   :  { %v750_v13 = vadd.f32 %v749_v12, %v747_v11 }
 0x21b   :  { %751 = vadd.xlane.f32.xlu0 %v750_v13 }
 0x2a8   :  { %v752_v15 = vpop.xlane.xlu0 %751 }
 0x2a9   :  { %v759_v16 = vadd.f32 %v848_v14, %v752_v15 }
 0x2ab   :  { %761 = vst.msk [vmem:[%s1153_s7] sm:$0xff] %vm760_vm0, %v759_v16 }
 0x2ac   :  { %766 = vsyncpa [#allocation4], 1 }
 0x2ad   :  { %767 = vsyncpa [#allocation6], 1 }

</bundles_post_ra>
